<compile_context>
chip_gen: v5e
topology: v5e:2x2
jax: 0.10.0
libtpu: 0.0.40
codegen_flags: <defaults>
</compile_context>

<pallas_src>
import functools

import numpy as np
import jax
import jax.numpy as jnp
from jax.experimental import pallas as pl
from jax.experimental.pallas import tpu as pltpu


def _cdiv(a, b):
    return (a + b - 1) // b


def _round_up(a, b):
    return _cdiv(a, b) * b


def _largest_tile_divisor(total, cap, granule=128):
    """Largest multiple-of-`granule` divisor of `total` that is <= cap."""
    best = granule
    q = total // granule
    for d in range(1, q + 1):
        if q % d == 0 and d * granule <= cap:
            best = d * granule
    return best


def _apply_activation(x, activation):
    if activation == "relu":
        return jnp.maximum(x, 0.0)
    if activation == "lrelu":
        # nn.LeakyReLU() default slope 0.01; the sqrt(2) gain returned by
        # get_activation is discarded by bias_act, so it is not applied.
        return jnp.where(x >= 0, x, 0.01 * x)
    return x  # 'linear'


# ---------------------------- Pallas kernels --------------------------------

def _gemm_single_k_kernel(a_ref, b_ref, o_ref, *, activation):
    # Whole K in one step: no accumulator scratch, weight block resident.
    acc = jnp.dot(a_ref[...], b_ref[...], preferred_element_type=jnp.float32)
    o_ref[...] = _apply_activation(acc, activation).astype(o_ref.dtype)


def _gemm_acc_kernel(a_ref, b_ref, o_ref, acc_ref, *, activation):
    # a_ref: (TM, TK) bf16, b_ref: (TK, TN) bf16, acc_ref: (TM, TN) f32 scratch.
    k = pl.program_id(2)
    partial = jnp.dot(a_ref[...], b_ref[...], preferred_element_type=jnp.float32)

    @pl.when(k == 0)
    def _():
        acc_ref[...] = partial          # direct assign: no zero-init store

    @pl.when(k > 0)
    def _():
        acc_ref[...] += partial

    @pl.when(k == pl.num_programs(2) - 1)
    def _():
        o_ref[...] = _apply_activation(acc_ref[...], activation).astype(o_ref.dtype)


# ---------------------------- tiling heuristics ------------------------------

_VMEM_TILE_BUDGET = 24 * 1024 * 1024   # conservative for v7x (64 MiB physical)


def _select_tiles(M, Kp, Cp):
    tk = Kp if Kp <= 2048 else _largest_tile_divisor(Kp, cap=512)
    tn = Cp if Cp <= 512 else _largest_tile_divisor(Cp, cap=512)
    tm = 512 if M >= 512 else max(128, _round_up(M, 128))

    def working_set(tm_):
        return (2 * tm_ * tk * 2        # double-buffered bf16 A blocks
                + 2 * tk * tn * 2       # double-buffered bf16 B blocks
                + 2 * tm_ * tn * 4      # double-buffered f32 out blocks
                + tm_ * tn * 4)         # f32 accumulator scratch

    while working_set(tm) > _VMEM_TILE_BUDGET and tm > 128:
        tm //= 2
    # Expose >= 2 parallel tiles so v7x's two TensorCores both get work.
    if (_cdiv(M, tm) * (Cp // tn)) < 2 and tm >= 256:
        tm //= 2
    return tm, tn, tk, working_set(tm)


# ---------------------------- conv wrappers ----------------------------------

def conv2d_layer_nhwc(x_nhwc, weight_oihw, *, kernel_size, activation="linear",
                      down=1, compute_dtype=jnp.bfloat16, out_dtype=None):
    """Conv2dLayer.forward on NHWC activations (transpose-free entry point)."""
    assert kernel_size in (1, 3)
    assert activation in ("linear", "relu", "lrelu")
    N, H, W, Cin = x_nhwc.shape
    Cout = weight_oihw.shape[0]
    assert weight_oihw.shape == (Cout, Cin, kernel_size, kernel_size)
    out_dtype = x_nhwc.dtype if out_dtype is None else out_dtype

    pad = 0 if kernel_size == 1 else 1
    Ho = (H + 2 * pad - kernel_size) // down + 1
    Wo = (W + 2 * pad - kernel_size) // down + 1

    # -------- wrapper-side layout plumbing (im2col); FLOPs stay in-kernel ----
    x = x_nhwc.astype(compute_dtype)               # bf16 early: halves HBM traffic
    if pad:
        x = jnp.pad(x, ((0, 0), (pad, pad), (pad, pad), (0, 0)))

    cols = []
    for kh in range(kernel_size):
        for kw in range(kernel_size):
            cols.append(x[:,
                          kh: kh + (Ho - 1) * down + 1: down,
                          kw: kw + (Wo - 1) * down + 1: down,
                          :])
    patches = cols[0] if len(cols) == 1 else jnp.concatenate(cols, axis=-1)

    M = N * Ho * Wo
    K = kernel_size * kernel_size * Cin
    patches = patches.reshape(M, K)                                   # (M, K)

    # OIHW -> HWIO -> (k*k*Cin, Cout); matches the (kh, kw, cin) patch order.
    wmat = (jnp.transpose(weight_oihw, (2, 3, 1, 0))
            .reshape(K, Cout).astype(compute_dtype))

    # Pad K/Cout only to 128 (lane granularity); pick tiles adaptively.
    Kp = _round_up(K, 128)
    Cp = _round_up(Cout, 128)
    tm, tn, tk, ws = _select_tiles(M, Kp, Cp)
    Mp = _round_up(M, tm)

    patches = jnp.pad(patches, ((0, Mp - M), (0, Kp - K)))
    wmat = jnp.pad(wmat, ((0, Kp - K), (0, Cp - Cout)))

    gemm_out_dtype = jnp.bfloat16 if out_dtype == jnp.bfloat16 else jnp.float32
    out_itemsize = 2 if gemm_out_dtype == jnp.bfloat16 else 4

    cost = pl.CostEstimate(
        flops=2 * M * K * Cout,
        transcendentals=0,
        bytes_accessed=Mp * Kp * 2 + Kp * Cp * 2 + Mp * Cp * out_itemsize)
    vmem_limit = int(min(48 * 1024 * 1024,
                         max(32 * 1024 * 1024, int(ws * 1.5))))

    num_k = Kp // tk
    if num_k == 1:
        # Single contraction step: weight block is resident (constant index
        # along i), no accumulator scratch, direct store.
        out = pl.pallas_call(
            functools.partial(_gemm_single_k_kernel, activation=activation),
            out_shape=jax.ShapeDtypeStruct((Mp, Cp), gemm_out_dtype),
            grid_spec=pltpu.PrefetchScalarGridSpec(
                num_scalar_prefetch=0,
                grid=(Mp // tm, Cp // tn),
                in_specs=[
                    pl.BlockSpec((tm, Kp), lambda i, j: (i, 0)),
                    pl.BlockSpec((Kp, tn), lambda i, j: (0, j)),
                ],
                out_specs=pl.BlockSpec((tm, tn), lambda i, j: (i, j)),
            ),
            compiler_params=pltpu.CompilerParams(
                dimension_semantics=("parallel", "parallel"),
                vmem_limit_bytes=vmem_limit),
            cost_estimate=cost,
        )(patches, wmat)
    else:
        out = pl.pallas_call(
            functools.partial(_gemm_acc_kernel, activation=activation),
            out_shape=jax.ShapeDtypeStruct((Mp, Cp), gemm_out_dtype),
            grid_spec=pltpu.PrefetchScalarGridSpec(
                num_scalar_prefetch=0,
                grid=(Mp // tm, Cp // tn, num_k),
                in_specs=[
                    pl.BlockSpec((tm, tk), lambda i, j, kk: (i, kk)),
                    pl.BlockSpec((tk, tn), lambda i, j, kk: (kk, j)),
                ],
                out_specs=pl.BlockSpec((tm, tn), lambda i, j, kk: (i, j)),
                scratch_shapes=[pltpu.VMEM((tm, tn), jnp.float32)],
            ),
            compiler_params=pltpu.CompilerParams(
                dimension_semantics=("parallel", "parallel", "arbitrary"),
                vmem_limit_bytes=vmem_limit),
            cost_estimate=cost,
        )(patches, wmat)

    out = out[:M, :Cout].reshape(N, Ho, Wo, Cout)
    return out.astype(out_dtype)


def conv2d_layer(x_nchw, weight_oihw, *, kernel_size, activation="linear",
                 down=1, compute_dtype=jnp.bfloat16, out_dtype=None):
    """NCHW interface matching the torch module.  When chaining several layers,
    call conv2d_layer_nhwc directly and keep activations NHWC end-to-end to
    avoid the two full-tensor transpose HBM round trips per conv."""
    x_nhwc = jnp.transpose(x_nchw, (0, 2, 3, 1))
    out = conv2d_layer_nhwc(
        x_nhwc, weight_oihw, kernel_size=kernel_size, activation=activation,
        down=down, compute_dtype=compute_dtype,
        out_dtype=x_nchw.dtype if out_dtype is None else out_dtype)
    return jnp.transpose(out, (0, 3, 1, 2))


# ---------------------------- reference & test -------------------------------

def _reference_conv(x, w, *, stride, pad):
    # Reference on bf16-rounded inputs: the kernel multiplies bf16 values
    # (exact in f32) and accumulates in f32, so this matches to f32 roundoff.
    xb = x.astype(jnp.bfloat16).astype(jnp.float32)
    wb = w.astype(jnp.bfloat16).astype(jnp.float32)
    return jax.lax.conv_general_dilated(
        xb, wb, window_strides=(stride, stride),
        padding=((pad, pad), (pad, pad)),
        dimension_numbers=("NCHW", "OIHW", "NCHW"),
        precision=jax.lax.Precision.HIGHEST)


if __name__ == "__main__":
    # Small shapes consistent with the module: NCHW input.
    N, Cin, Cout, H, W = 2, 4, 8, 16, 16

    key = jax.random.PRNGKey(0)
    kx, kw3, kw1 = jax.random.split(key, 3)
    x = jax.random.normal(kx, (N, Cin, H, W), dtype=jnp.float32)

    # Deterministic init matching __init__: randn([O, I/groups, k, k]) * weight_gain
    wg3 = 1.0 / np.sqrt(Cin * 3 ** 2)
    w3 = jax.random.normal(kw3, (Cout, Cin, 3, 3), dtype=jnp.float32) * wg3
    wg1 = 1.0 / np.sqrt(Cin * 1 ** 2)
    w1 = jax.random.normal(kw1, (Cout, Cin, 1, 1), dtype=jnp.float32) * wg1

    # k=3, stride 1 (default Conv2dLayer config, activation='linear')
    out3 = jax.block_until_ready(
        conv2d_layer(x, w3, kernel_size=3, activation="linear", down=1))
    ref3 = _reference_conv(x, w3, stride=1, pad=1)
    np.testing.assert_allclose(np.asarray(out3), np.asarray(ref3),
                               rtol=2e-3, atol=2e-3)

    # k=1, stride 1
    out1 = jax.block_until_ready(
        conv2d_layer(x, w1, kernel_size=1, activation="linear", down=1))
    ref1 = _reference_conv(x, w1, stride=1, pad=0)
    np.testing.assert_allclose(np.asarray(out1), np.asarray(ref1),
                               rtol=2e-3, atol=2e-3)

    # k=3, down=2 (strided conv via strided patch extraction)
    outd = jax.block_until_ready(
        conv2d_layer(x, w3, kernel_size=3, activation="linear", down=2))
    refd = _reference_conv(x, w3, stride=2, pad=1)
    np.testing.assert_allclose(np.asarray(outd), np.asarray(refd),
                               rtol=2e-3, atol=2e-3)

    # k=3, relu activation path
    outr = jax.block_until_ready(
        conv2d_layer(x, w3, kernel_size=3, activation="relu", down=1))
    np.testing.assert_allclose(np.asarray(outr),
                               np.maximum(np.asarray(ref3), 0.0),
                               rtol=2e-3, atol=2e-3)

    print("KERNEL_OK")
</pallas_src>

<mosaic_0001>
module attributes {stable_mosaic.version = 11 : i64} {
  func.func @_gemm_single_k_kernel(%arg0: i32, %arg1: i32, %arg2: memref<256x128xbf16, #tpu.memory_space<vmem>>, %arg3: memref<128x128xbf16, #tpu.memory_space<vmem>>, %arg4: memref<256x128xf32, #tpu.memory_space<vmem>>) attributes {dimension_semantics = [#tpu.dimension_semantics<parallel>, #tpu.dimension_semantics<parallel>], iteration_bounds = array<i64: 2, 1>, scalar_prefetch = 0 : i64, scratch_operands = 0 : i64, tpu.core_type = #tpu.core_type<tc>, window_params = [{transform_indices = @transform_0, window_bounds = array<i64: 256, 128>}, {transform_indices = @transform_1, window_bounds = array<i64: 128, 128>}, {transform_indices = @transform_2, window_bounds = array<i64: 256, 128>}]} {
    %c0 = arith.constant 0 : index
    %c0_0 = arith.constant 0 : index
    %0 = vector.load %arg2[%c0, %c0_0] : memref<256x128xbf16, #tpu.memory_space<vmem>>, vector<256x128xbf16>
    %c0_1 = arith.constant 0 : index
    %c0_2 = arith.constant 0 : index
    %1 = vector.load %arg3[%c0_1, %c0_2] : memref<128x128xbf16, #tpu.memory_space<vmem>>, vector<128x128xbf16>
    %cst = arith.constant dense<0.000000e+00> : vector<256x128xf32>
    %2 = tpu.matmul %0, %1, %cst {dimension_numbers = #tpu.dot_dimension_numbers<[1], [0], [0], [1], [0, 0, 1, 1], [], []>} : vector<256x128xbf16>, vector<128x128xbf16>, vector<256x128xf32> -> vector<256x128xf32>
    %c0_3 = arith.constant 0 : index
    %c0_4 = arith.constant 0 : index
    %3 = vector.load %arg4[%c0_3, %c0_4] : memref<256x128xf32, #tpu.memory_space<vmem>>, vector<256x128xf32>
    tpu.vector_store %arg4[%c0_3, %c0_4], %2 {strides = array<i32>} : memref<256x128xf32, #tpu.memory_space<vmem>>, vector<256x128xf32>,
    return
  }
  func.func @transform_0(%arg0: i32, %arg1: i32) -> (i32, i32) {
    %c0_i32 = arith.constant 0 : i32
    %c0_i32_0 = arith.constant 0 : i32
    return %arg0, %c0_i32 : i32, i32
  }
  func.func @transform_1(%arg0: i32, %arg1: i32) -> (i32, i32) {
    %c0_i32 = arith.constant 0 : i32
    %c0_i32_0 = arith.constant 0 : i32
    return %c0_i32, %arg1 : i32, i32
  }
  func.func @transform_2(%arg0: i32, %arg1: i32) -> (i32, i32) {
    %c0_i32 = arith.constant 0 : i32
    return %arg0, %arg1 : i32, i32
  }
}

</mosaic_0001>

<bundles_post_ra>
// kernel: tpu_custom_call.1
= control target key start
LH: loop header
LB: loop body
LE: loop exit
PB: predicated region body
PF: predicated region fallthrough
CT: control target
= control target key end

     0   :  { %7 = vsyncpa [#allocation3], 0  ;;  %s1246_s0 = inlined_call_operand.hbm [shape: bf16[512,128], index: 0, kind: input, shape index: {}]   ;;  %s1247_s1 = inlined_call_operand.hbm [shape: bf16[128,128], index: 1, kind: input, shape index: {}]   ;;  %s1248_s2 = inlined_call_operand.hbm [shape: f32[512,128], index: 2, kind: output, shape index: {}]  }
   0x1   :  { %9 = vsyncpa [#allocation3 + $0x1], 0 }
   0x2   :  { %10 = vsyncpa [#allocation6], 0 }
   0x3   :  { %11 = vsyncpa [#allocation4], 0 }
   0x4   :  { %13 = vsyncpa [#allocation4 + $0x1], 0  ;;  %s1037_s9 = smov 0   ;;  %s1039_s10 = smov 0  }
   0x5   :  { %s1041_s11 = smov 0   ;;  %s1043_s12 = smov 0  }
   0x6   :  { %s1045_s13 = smov 0   ;;  %s1047_s14 = smov 0  }
   0x7 LB: > { %s629_s15 = sadd.s32 4294967295, %s1015_s14   ;;  %s630_s16 = sadd.s32 4294967294, %s1015_s14   ;;  %s1015_s14 = sphi %s1047_s14, %s19_s14   ;;  %s1011_s13 = sphi %s1045_s13, %s1260_s13   ;;  %s1007_s12 = sphi %s1043_s12, %s1259_s12   ;;  %s1003_s11 = sphi %s1041_s11, %s1258_s11   ;;  %s999_s10 = sphi %s1039_s10, %s1257_s10   ;;  %s995_s9 = sphi %s1037_s9, %s1256_s9  }
   0x8   : > { %p51_p0 = scmp.ne.s32.totalorder %s999_s10, %s995_s9  ;;  %p1071_p1 = scmp.eq.s32.totalorder %s629_s15, 0 }
   0x9   : > { %p1075_p2 = scmp.eq.s32.totalorder %s629_s15, 1  ;;  %p109_p3 = scmp.eq.s32.totalorder %s630_s16, 1 }
   0xa   : > { %p1081_p4 = por %p1071_p1, %p51_p0  ;;  %p631_p5 = scmp.ge.s32.totalorder %s1015_s14, 1 }
   0xb   : > { %p1086_p6 = por %p109_p3, %p51_p0  ;;  %p116_p7 = scmp.lt.s32.totalorder %s1015_s14, 3 }
   0xc   : > { %s129_s23 = sshll.u32 %s1247_s1, 4  ;;  %s1017_s25 = smov [#allocation5]   ;;  %s130_s23 = int_to_ptr.hbm [resolvable:$true] %s129_s23 }
   0xd   : > { %p1094_p8 = pnand %p631_p5, %p116_p7  ;;  %s131_s26 = sshll.u32 %s1017_s25, 4  ;;  %s132_s26 = int_to_ptr.vmem [resolvable:$true] %s131_s26 }
   0xe   : > { %p633_p11 = scmp.ge.s32.totalorder %s1015_s14, 2  ;;  %s1018_s27 = smov 64  }
   0xf   : > { %p800_p9 = pneg %p1094_p8  ;;  %s1019_s28 = smov 4  }
  0x10   : > { %s31_s29 = sadd.s32 1, %s1011_s13  ;;  %s38_s30 = sadd.s32 1, %s1003_s11 }
  0x11   : > { %p801_p10 = pnand %p800_p9, %p1071_p1  ;;  %p33_p12 = scmp.ge.s32.totalorder %s31_s29, 2 }
  0x12   : > { %p45_p13 = scmp.ne.s32.totalorder %s1003_s11, %s999_s10  ;;  %p46_p0 = scmp.eq.s32.totalorder %s1015_s14, 0 }
  0x13   : > { %803 = dma.hbm_to_vmem [thread:$0]  (!%p801_p10), %s130_s23, 1024, %s132_s26, [#allocation6], %s1018_s27, %s1018_s27, %s1019_s28  }
  0x14   : > { %s1262_s29 = smov (%p33_p12, %s31_s29), 0  ;;  %p1113_p3 = por %p46_p0, %p45_p13 }
  0x15   : > { %p1119_p5 = por %p1075_p2, %p45_p13  ;;  %s35_s5 = ssub.s32 %s1011_s13, %s1262_s29 }
  0x16   : > { %p813_p7 = scmp.lt.s32.totalorder %s1015_s14, 2  ;;  %p36_p9 = scmp.eq.s32.totalorder %s35_s5, 0 }
  0x17   : > { %s145_s6 = sand.u32 1, %s1003_s11   ;;  %s742_s15 = sshll.u32 %s1011_s13, 7 }
  0x18   : > { %s634_s7 = sshll.u32 %s145_s6, 7  ;;  %s154_s22 = scalar_lea.hbm %s1246_s0, %s742_s15 }
  0x19   : > { %s1128_s8 = scalar_select %p36_p9, %s1003_s11, %s38_s30  }
  0x1a   : > { %s149_s23 = scalar_lea.vmem [#allocation2], %s634_s7  ;;  %s155_s18 = sshll.u32 %s154_s22, 4  ;;  %s156_s18 = int_to_ptr.hbm [resolvable:$true] %s155_s18 }
  0x1b   : > { %s157_s25 = sshll.u32 %s149_s23, 4  ;;  %p805_p2 = pnand %p813_p7, %p1113_p3  ;;  %s158_s25 = int_to_ptr.vmem [resolvable:$true] %s157_s25 }
  0x1c   : > { %s146_s26 = scalar_lea.sflag [#allocation3], %s145_s6  ;;  %169 = sbr.rel (%p1094_p8) target bundleno = 262 (0x106), region = 28 }
  0x1d   : > { %807 = dma.hbm_to_vmem [thread:$0]  (!%p805_p2), %s156_s18, 2048, %s158_s25, %s146_s26, %s1018_s27, %s1018_s27, %s1019_s28  }
  0x1e   : > { %s1142_s30 = sand.u32 (!%p1094_p8), 1, %s999_s10  }
  0x1f   : > { %s638_s5 = sshll.u32 (!%p1094_p8), %s1142_s30, 7  ;;  %s172_s7 = scalar_lea.sflag (!%p1094_p8), [#allocation3], %s1142_s30 }
  0x20   : > { %s1146_s15 = scalar_lea.vmem (!%p1094_p8), [#allocation2], %s638_s5 }
  0x21   : > { %982 = dma.done.wait (%p1081_p4), %s172_s7, 2048  }
  0x22   : > { %984 = vsyncadd (%p1081_p4), %s172_s7, 4294965248 }
  0x23   : > { %986 = dma.done.wait (%p1071_p1), [#allocation6], 1024  }
  0x24   : > { %988 = vsyncadd (%p1071_p1), [#allocation6], 4294966272  ;;  %v766_v0 = vld [vmem:[#allocation5 + $0x38] sm:$0xff]  ;;  %v765_v1 = vld [vmem:[#allocation5 + $0x30] sm:$0xff]  ;;  %s640_s17 = sshll.u32 %s1142_s30, 8  ;;  %s767_s24 = sshll.u32 %s1007_s12, 8 }
  0x25   : > { %396 = vmatpush.bf16.msra.mxu0 %v766_v0  ;;  %768 = vmatpush.bf16.msra.mxu1 %v766_v0  ;;  %v764_v2 = vld [vmem:[#allocation5 + $0x28] sm:$0xff]  ;;  %v763_v3 = vld [vmem:[#allocation5 + $0x20] sm:$0xff]  ;;  %v762_v4 = vld [vmem:[#allocation5 + $0x18] sm:$0xff]  ;;  %s1173_s19 = scalar_lea.vmem [#allocation7], %s640_s17  ;;  %s530_s3 = scalar_lea.hbm %s1248_s2, %s767_s24 }
  0x26   : > { %769 = vmatpush.bf16.msra.mxu2 %v766_v0  ;;  %770 = vmatpush.bf16.msra.mxu3 %v766_v0  ;;  %v761_v5 = vld [vmem:[#allocation5 + $0x10] sm:$0xff]  ;;  %v760_v6 = vld [vmem:[#allocation5 + $0x8] sm:$0xff]  ;;  %v759_v7 = vld [vmem:[#allocation5] sm:$0xff]  ;;  %s531_s6 = sshll.u32 %s1173_s19, 4  ;;  %s533_s16 = sshll.u32 %s530_s3, 4  ;;  %s532_s6 = int_to_ptr.vmem [resolvable:$true] %s531_s6  ;;  %s534_s16 = int_to_ptr.hbm [resolvable:$true] %s533_s16 }
  0x27   : > { %v743_v8 = vld [vmem:[%s1146_s15] sm:$0xff]  ;;  %v744_v12 = vld [vmem:[%s1146_s15 + $0x8] sm:$0xff]  ;;  %v745_v16 = vld [vmem:[%s1146_s15 + $0x10] sm:$0xff]  ;;  %s518_s12 = scalar_lea.sflag [#allocation4], %s1142_s30  ;;  %s943_s21 = sshra.s32 %s534_s16, 4  ;;  %s944_s21 = int_to_ptr.hbm [resolvable:$true] %s943_s21 }
  0x28   : > { %v747_v9 = vld [vmem:[%s1146_s15 + $0x20] sm:$0xff]  ;;  %v748_v13 = vld [vmem:[%s1146_s15 + $0x28] sm:$0xff]  ;;  %v749_v17 = vld [vmem:[%s1146_s15 + $0x30] sm:$0xff]  ;;  %s945_s22 = scalar_lea.hbm %s944_s21, 256  ;;  %s949_s18 = scalar_lea.hbm %s1248_s2, 512 }
  0x29   : > { %397 = vmatpush.bf16.msra.mxu0 %v765_v1  ;;  %771 = vmatpush.bf16.msra.mxu1 %v765_v1  ;;  %v751_v10 = vld [vmem:[%s1146_s15 + $0x40] sm:$0xff]  ;;  %v752_v14 = vld [vmem:[%s1146_s15 + $0x48] sm:$0xff]  ;;  %v753_v18 = vld [vmem:[%s1146_s15 + $0x50] sm:$0xff]  ;;  %p946_p1 = scmp.ne.s32.totalorder %s944_s21, %s945_s22  ;;  %p950_p10 = scmp.lt.s32.totalorder %s944_s21, %s1248_s2 }
  0x2a   : > { %772 = vmatpush.bf16.msra.mxu2 %v765_v1  ;;  %773 = vmatpush.bf16.msra.mxu3 %v765_v1  ;;  %v755_v11 = vld [vmem:[%s1146_s15 + $0x60] sm:$0xff]  ;;  %v756_v15 = vld [vmem:[%s1146_s15 + $0x68] sm:$0xff]  ;;  %v757_v19 = vld [vmem:[%s1146_s15 + $0x70] sm:$0xff]  ;;  %p951_p12 = scmp.lt.s32.totalorder %s949_s18, %s945_s22 }
  0x2b   : > { %v746_v20 = vld [vmem:[%s1146_s15 + $0x18] sm:$0xff]  ;;  %p947_p4 = pnand %p946_p1, %p1119_p5 }
  0x2c   : > { %v750_v21 = vld [vmem:[%s1146_s15 + $0x38] sm:$0xff]  ;;  %p952_p13 = por %p951_p12, %p950_p10 }
  0x2d   : > { %398 = vmatpush.bf16.msra.mxu0 %v764_v2  ;;  %774 = vmatpush.bf16.msra.mxu1 %v764_v2  ;;  %v754_v22 = vld [vmem:[%s1146_s15 + $0x58] sm:$0xff]  ;;  %p948_p8 = pneg %p947_p4 }
  0x2e   : > { %775 = vmatpush.bf16.msra.mxu2 %v764_v2  ;;  %776 = vmatpush.bf16.msra.mxu3 %v764_v2  ;;  %v758_v23 = vld [vmem:[%s1146_s15 + $0x78] sm:$0xff] }
  0x2f   : > { %p953_p0 = pnand %p952_p13, %p948_p8 }
  0x31   : > { %399 = vmatpush.bf16.msra.mxu0 %v763_v3  ;;  %777 = vmatpush.bf16.msra.mxu1 %v763_v3 }
  0x32   : > { %778 = vmatpush.bf16.msra.mxu2 %v763_v3  ;;  %779 = vmatpush.bf16.msra.mxu3 %v763_v3 }
  0x35   : > { %400 = vmatpush.bf16.msra.mxu0 %v762_v4  ;;  %780 = vmatpush.bf16.msra.mxu1 %v762_v4 }
  0x36   : > { %781 = vmatpush.bf16.msra.mxu2 %v762_v4  ;;  %782 = vmatpush.bf16.msra.mxu3 %v762_v4 }
  0x39   : > { %401 = vmatpush.bf16.msra.mxu0 %v761_v5  ;;  %783 = vmatpush.bf16.msra.mxu1 %v761_v5 }
  0x3a   : > { %784 = vmatpush.bf16.msra.mxu2 %v761_v5  ;;  %785 = vmatpush.bf16.msra.mxu3 %v761_v5 }
  0x3d   : > { %402 = vmatpush.bf16.msra.mxu0 %v760_v6  ;;  %786 = vmatpush.bf16.msra.mxu1 %v760_v6 }
  0x3e   : > { %787 = vmatpush.bf16.msra.mxu2 %v760_v6  ;;  %788 = vmatpush.bf16.msra.mxu3 %v760_v6 }
  0x41   : > { %403 = vmatpush.bf16.msra.mxu0 %v759_v7  ;;  %789 = vmatpush.bf16.msra.mxu1 %v759_v7 }
  0x42   : > { %790 = vmatpush.bf16.msra.mxu2 %v759_v7  ;;  %791 = vmatpush.bf16.msra.mxu3 %v759_v7 }
  0x44   : > { %404 = vmatmul.bf16.vlgmr.msra.gmra.mxu0 %v743_v8  ;;  %424 = vmatmul.bf16.vlgmr.msra.gmra.mxu1 %v747_v9 }
  0x45   : > { %444 = vmatmul.bf16.vlgmr.msra.gmra.mxu2 %v751_v10  ;;  %464 = vmatmul.bf16.vlgmr.msra.gmra.mxu3 %v755_v11 }
  0x54   : > { %409 = vmatmul.bf16.gmra.mxu0 %v744_v12  ;;  %429 = vmatmul.bf16.gmra.mxu1 %v748_v13 }
  0x55   : > { %449 = vmatmul.bf16.gmra.mxu2 %v752_v14  ;;  %469 = vmatmul.bf16.gmra.mxu3 %v756_v15 }
  0x64   : > { %414 = vmatmul.bf16.gmra.mxu0 %v745_v16  ;;  %434 = vmatmul.bf16.gmra.mxu1 %v749_v17 }
  0x65   : > { %454 = vmatmul.bf16.gmra.mxu2 %v753_v18  ;;  %474 = vmatmul.bf16.gmra.mxu3 %v757_v19 }
  0x74   : > { %419 = vmatmul.bf16.gmra.mxu0 %v746_v20  ;;  %439 = vmatmul.bf16.gmra.mxu1 %v750_v21 }
  0x75   : > { %459 = vmatmul.bf16.gmra.mxu2 %v754_v22  ;;  %479 = vmatmul.bf16.gmra.mxu3 %v758_v23 }
  0xc1   : > { %v405_v24 = vpop.f32.mrf.mxu0  ;;  %v425_v25 = vpop.f32.mrf.mxu1 }
  0xc2   : > { %485 = vst [vmem:[%s1173_s19] sm:$0xff] %v405_v24 }
  0xc3   : > { %493 = vst [vmem:[%s1173_s19 + $0x40] sm:$0xff] %v425_v25 }
  0xc8   : > { %v445_v26 = vpop.f32.mrf.mxu2  ;;  %v465_v27 = vpop.f32.mrf.mxu3 }
  0xc9   : > { %501 = vst [vmem:[%s1173_s19 + $0x80] sm:$0xff] %v445_v26  ;;  %v407_v28 = vpop.f32.mrf.mxu0  ;;  %v427_v29 = vpop.f32.mrf.mxu1 }
  0xca   : > { %509 = vst [vmem:[%s1173_s19 + $0xc0] sm:$0xff] %v465_v27 }
  0xcb   : > { %486 = vst [vmem:[%s1173_s19 + $0x8] sm:$0xff] %v407_v28 }
  0xcc   : > { %494 = vst [vmem:[%s1173_s19 + $0x48] sm:$0xff] %v427_v29 }
  0xd0   : > { %v447_v30 = vpop.f32.mrf.mxu2  ;;  %v467_v31 = vpop.f32.mrf.mxu3 }
  0xd1   : > { %502 = vst [vmem:[%s1173_s19 + $0x88] sm:$0xff] %v447_v30  ;;  %v410_v32 = vpop.f32.mrf.mxu0  ;;  %v430_v33 = vpop.f32.mrf.mxu1 }
  0xd2   : > { %510 = vst [vmem:[%s1173_s19 + $0xc8] sm:$0xff] %v467_v31 }
  0xd3   : > { %487 = vst [vmem:[%s1173_s19 + $0x10] sm:$0xff] %v410_v32 }
  0xd4   : > { %495 = vst [vmem:[%s1173_s19 + $0x50] sm:$0xff] %v430_v33 }
  0xd8   : > { %v450_v34 = vpop.f32.mrf.mxu2  ;;  %v470_v35 = vpop.f32.mrf.mxu3 }
  0xd9   : > { %503 = vst [vmem:[%s1173_s19 + $0x90] sm:$0xff] %v450_v34  ;;  %v412_v36 = vpop.f32.mrf.mxu0  ;;  %v432_v37 = vpop.f32.mrf.mxu1 }
  0xda   : > { %511 = vst [vmem:[%s1173_s19 + $0xd0] sm:$0xff] %v470_v35 }
  0xdb   : > { %488 = vst [vmem:[%s1173_s19 + $0x18] sm:$0xff] %v412_v36 }
  0xdc   : > { %496 = vst [vmem:[%s1173_s19 + $0x58] sm:$0xff] %v432_v37 }
  0xe0   : > { %v452_v38 = vpop.f32.mrf.mxu2  ;;  %v472_v39 = vpop.f32.mrf.mxu3 }
  0xe1   : > { %504 = vst [vmem:[%s1173_s19 + $0x98] sm:$0xff] %v452_v38  ;;  %v415_v40 = vpop.f32.mrf.mxu0  ;;  %v435_v41 = vpop.f32.mrf.mxu1 }
  0xe2   : > { %512 = vst [vmem:[%s1173_s19 + $0xd8] sm:$0xff] %v472_v39 }
  0xe3   : > { %489 = vst [vmem:[%s1173_s19 + $0x20] sm:$0xff] %v415_v40 }
  0xe4   : > { %497 = vst [vmem:[%s1173_s19 + $0x60] sm:$0xff] %v435_v41 }
  0xe8   : > { %v455_v42 = vpop.f32.mrf.mxu2  ;;  %v475_v43 = vpop.f32.mrf.mxu3 }
  0xe9   : > { %505 = vst [vmem:[%s1173_s19 + $0xa0] sm:$0xff] %v455_v42  ;;  %v417_v44 = vpop.f32.mrf.mxu0  ;;  %v437_v45 = vpop.f32.mrf.mxu1 }
  0xea   : > { %513 = vst [vmem:[%s1173_s19 + $0xe0] sm:$0xff] %v475_v43 }
  0xeb   : > { %490 = vst [vmem:[%s1173_s19 + $0x28] sm:$0xff] %v417_v44 }
  0xec   : > { %498 = vst [vmem:[%s1173_s19 + $0x68] sm:$0xff] %v437_v45 }
  0xf0   : > { %v457_v46 = vpop.f32.mrf.mxu2  ;;  %v477_v47 = vpop.f32.mrf.mxu3 }
  0xf1   : > { %506 = vst [vmem:[%s1173_s19 + $0xa8] sm:$0xff] %v457_v46  ;;  %v420_v48 = vpop.f32.mrf.mxu0  ;;  %v440_v49 = vpop.f32.mrf.mxu1 }
  0xf2   : > { %514 = vst [vmem:[%s1173_s19 + $0xe8] sm:$0xff] %v477_v47 }
  0xf3   : > { %491 = vst [vmem:[%s1173_s19 + $0x30] sm:$0xff] %v420_v48 }
  0xf4   : > { %499 = vst [vmem:[%s1173_s19 + $0x70] sm:$0xff] %v440_v49 }
  0xf8   : > { %v460_v50 = vpop.f32.mrf.mxu2  ;;  %v480_v51 = vpop.f32.mrf.mxu3 }
  0xf9   : > { %507 = vst [vmem:[%s1173_s19 + $0xb0] sm:$0xff] %v460_v50  ;;  %v422_v52 = vpop.f32.mrf.mxu0  ;;  %v442_v53 = vpop.f32.mrf.mxu1 }
  0xfa   : > { %515 = vst [vmem:[%s1173_s19 + $0xf0] sm:$0xff] %v480_v51 }
  0xfb   : > { %492 = vst [vmem:[%s1173_s19 + $0x38] sm:$0xff] %v422_v52 }
  0xfc   : > { %500 = vst [vmem:[%s1173_s19 + $0x78] sm:$0xff] %v442_v53 }
 0x100   : > { %v462_v54 = vpop.f32.mrf.mxu2  ;;  %v482_v55 = vpop.f32.mrf.mxu3 }
 0x101   : > { %508 = vst [vmem:[%s1173_s19 + $0xb8] sm:$0xff] %v462_v54 }
 0x102   : > { %516 = vst [vmem:[%s1173_s19 + $0xf8] sm:$0xff] %v482_v55 }
 0x103   : > { %956 = shalt.err (!%p953_p0)
}
 0x104   : > { %s1020_s30 = smov 128   ;;  %s1021_s7 = smov 8  }
 0x105   : > { %798 = dma.vmem_to_hbm [thread:$0]  (%p1119_p5), %s532_s6, 4096, %s534_s16, %s518_s12, %s1020_s30, %s1020_s30, %s1021_s7  }
 0x106 PF: > { %s548_s15 = sand.u32 1, %s995_s9   ;;  %p809_p3 = pnand %p633_p11, %p1086_p6 }
 0x107   : > { %s549_s17 = scalar_lea.sflag [#allocation4], %s548_s15 }
 0x108   : > { %p810_p7 = pneg %p809_p3 }
 0x10a   : > { %990 = dma.done.wait (%p810_p7), %s549_s17, 4096  }
 0x10b   : > { %992 = vsyncadd (%p810_p7), %s549_s17, 4294963200  ;;  %s19_s14 = sadd.s32 1, %s1015_s14   ;;  %s1256_s9 = smov %s999_s10 }
 0x10c   : > { %p16_p9 = scmp.ge.s32.totalorder %s19_s14, 4   ;;  %s1257_s10 = smov %s1003_s11 }
 0x10d   : > { %s1258_s11 = smov %s1128_s8  ;;  %s1259_s12 = smov %s1011_s13 }
 0x10e   : > { %s1260_s13 = smov %s1262_s29  ;;  %18 = sbr.rel (!%p16_p9) target bundleno = 7 (0x7), region = 78 }
 0x113   :  { %555 = vsyncpa [#allocation3], 1 }
 0x114   :  { %557 = vsyncpa [#allocation3 + $0x1], 1 }
 0x115   :  { %558 = vsyncpa [#allocation6], 1 }
 0x116   :  { %559 = vsyncpa [#allocation4], 1 }
 0x117   :  { %561 = vsyncpa [#allocation4 + $0x1], 1 }

</bundles_post_ra>
